<compile_context>
chip_gen: v7x
topology: tpu7x:2x2x1
jax: 0.10.0
libtpu: 0.0.40
codegen_flags: <defaults>
</compile_context>

<pallas_src>
import functools
import math

import jax
import jax.numpy as jnp
from jax import lax
from jax.experimental import pallas as pl
from jax.experimental.pallas import tpu as pltpu

# ----------------------------------------------------------------------------
# Synthetic deterministic qconfig (fake-quant params of activation_post_process)
# ----------------------------------------------------------------------------
_SCALE = 0.05
_INV_SCALE = 1.0 / _SCALE
_QMIN = -128.0
_QMAX = 127.0

_LANES = 128
_SUBLANES = 8
_BLOCK_ROWS = 8192                 # 8192*128*4B = 4 MiB per f32 elementwise block
_RED_TP = 256                      # suffix reduction: kept rows per block
_RED_TR = 2048                     # suffix reduction: reduced elems per block (x128)
_MM_BATCH_BUDGET = 4 * 1024 * 1024  # per-grid-step operand budget for batch blocking
_MM_IN_DTYPE = jnp.bfloat16        # MXU operand dtype (accumulation stays f32)


def _query_vmem_capacity():
    try:
        return int(pltpu.get_tpu_info().vmem_capacity_bytes)
    except Exception:
        return 64 * 1024 * 1024    # conservative fallback (v7x-sized)


_VMEM_CAP = _query_vmem_capacity()
# 96 MiB scoped limit on 128 MiB parts (v5e/v6e), 32 MiB on 64 MiB parts (v7x).
_VMEM_LIMIT = 96 * 1024 * 1024 if _VMEM_CAP >= 128 * 1024 * 1024 else 32 * 1024 * 1024


def _round_up(v, m):
    return ((v + m - 1) // m) * m


def _pick_tile(dim, max_tile, align):
    """Balanced tile <= ~max_tile that minimizes zero padding of `dim`."""
    dim = max(int(dim), 1)
    if dim <= max_tile:
        return _round_up(dim, align)
    nblocks = -(-dim // max_tile)
    return _round_up(-(-dim // nblocks), align)


def _fake_quant(r):
    # symmetric per-tensor int8 fake quantization; constant multiply, no divide.
    # TODO(synk): jnp.round is half-to-even; torch fake-quant half-away rounding
    # may differ by one int8 step exactly on .5 boundaries.
    return jnp.clip(jnp.round(r * _INV_SCALE), _QMIN, _QMAX) * _SCALE


# ----------------------------------------------------------------------------
# Elementwise kernels: flattened (rows, 128) slab, 4 MiB blocks, ragged last block
# ----------------------------------------------------------------------------
def _unary_kernel(op, x_ref, o_ref):
    o_ref[...] = _fake_quant(op(x_ref[...]))


def _binary_kernel(op, x_ref, y_ref, o_ref):
    o_ref[...] = _fake_quant(op(x_ref[...], y_ref[...]))


def _slab_geometry(n):
    rows = max(_SUBLANES, _round_up(-(-n // _LANES), _SUBLANES))
    br = min(rows, _BLOCK_ROWS)
    return rows, br


def _to_slab(x, rows, pad_value):
    flat = x.reshape(-1)
    n = flat.shape[0]
    padded = rows * _LANES
    if padded != n:  # only the last-lane tail is ever padded
        flat = jnp.pad(flat, (0, padded - n), constant_values=pad_value)
    return flat.reshape(rows, _LANES)


def _from_slab(out, n, shape):
    if out.size == n:
        return out.reshape(shape)
    return out.reshape(-1)[:n].reshape(shape)


def _ew_compiler_params():
    return pltpu.CompilerParams(
        dimension_semantics=("parallel",), vmem_limit_bytes=_VMEM_LIMIT)


def _ew_unary(op, x):
    x = jnp.asarray(x, jnp.float32)
    shape, n = x.shape, x.size
    rows, br = _slab_geometry(n)
    x2 = _to_slab(x, rows, 0.0)
    out = pl.pallas_call(
        functools.partial(_unary_kernel, op),
        out_shape=jax.ShapeDtypeStruct((rows, _LANES), jnp.float32),
        grid=(pl.cdiv(rows, br),),
        in_specs=[pl.BlockSpec((br, _LANES), lambda i: (i, 0))],
        out_specs=pl.BlockSpec((br, _LANES), lambda i: (i, 0)),
        compiler_params=_ew_compiler_params(),
    )(x2)
    return _from_slab(out, n, shape)


def _ew_binary(op, x, y, y_pad=0.0):
    # Python scalars are folded into a unary kernel as PYTHON floats (jaxpr
    # literals), never materialized / never captured as array constants.
    if isinstance(y, (int, float)) and not isinstance(x, (int, float)):
        c = float(y)
        return _ew_unary(lambda v: op(v, c), x)
    if isinstance(x, (int, float)) and not isinstance(y, (int, float)):
        c = float(x)
        return _ew_unary(lambda v: op(c, v), y)

    x = jnp.asarray(x, jnp.float32)
    y = jnp.asarray(y, jnp.float32)
    shape = jnp.broadcast_shapes(x.shape, y.shape)
    if x.shape != shape:
        # TODO(synk): non-scalar broadcasting still materializes the smaller
        # operand in HBM; an in-kernel broadcast BlockSpec could remove this copy.
        x = jnp.broadcast_to(x, shape)
    if y.shape != shape:
        y = jnp.broadcast_to(y, shape)

    n = math.prod(shape) if shape else 1
    rows, br = _slab_geometry(n)
    x2 = _to_slab(x, rows, 0.0)
    y2 = _to_slab(y, rows, y_pad)  # y_pad=1.0 for div: no NaN in the padded tail
    out = pl.pallas_call(
        functools.partial(_binary_kernel, op),
        out_shape=jax.ShapeDtypeStruct((rows, _LANES), jnp.float32),
        grid=(pl.cdiv(rows, br),),
        in_specs=[pl.BlockSpec((br, _LANES), lambda i: (i, 0)),
                  pl.BlockSpec((br, _LANES), lambda i: (i, 0))],
        out_specs=pl.BlockSpec((br, _LANES), lambda i: (i, 0)),
        compiler_params=_ew_compiler_params(),
    )(x2, y2)
    return _from_slab(out, n, shape)


# ----------------------------------------------------------------------------
# Matmul: bf16 MXU operands, f32 accumulation into the resident output block,
# transposes handled via dot_general dimension_numbers (no HBM transpose).
# ----------------------------------------------------------------------------
def _mm_max_tiles():
    if _VMEM_LIMIT >= 64 * 1024 * 1024:
        return 512, 512, 1024      # v5e / v6e: plenty of VMEM
    return 256, 256, 512           # v7x: only 64 MiB physical


def _mm_kernel(dn, k_axis, x_ref, y_ref, o_ref):
    @pl.when(pl.program_id(k_axis) == 0)
    def _():
        o_ref[...] = jnp.zeros_like(o_ref)

    o_ref[...] += lax.dot_general(
        x_ref[...], y_ref[...], dimension_numbers=dn,
        preferred_element_type=jnp.float32)

    @pl.when(pl.program_id(k_axis) == pl.num_programs(k_axis) - 1)
    def _():
        o_ref[...] = _fake_quant(o_ref[...])


def _matmul_2d(x2, y2, M, K, N, x_trans, y_trans):
    max_m, max_n, max_k = _mm_max_tiles()
    tm = _pick_tile(M, max_m, 128 if x_trans else 16)
    tn = _pick_tile(N, max_n, 128)
    tk = _pick_tile(K, max_k, 128)
    Mp, Kp, Np = _round_up(M, tm), _round_up(K, tk), _round_up(N, tn)

    xs = (Kp, Mp) if x_trans else (Mp, Kp)
    ys = (Np, Kp) if y_trans else (Kp, Np)
    if tuple(x2.shape) != xs:
        x2 = jnp.pad(x2, [(0, xs[0] - x2.shape[0]), (0, xs[1] - x2.shape[1])])
    if tuple(y2.shape) != ys:
        y2 = jnp.pad(y2, [(0, ys[0] - y2.shape[0]), (0, ys[1] - y2.shape[1])])

    if x_trans:
        x_spec = pl.BlockSpec((tk, tm), lambda i, j, k: (k, i)); cx = 0
    else:
        x_spec = pl.BlockSpec((tm, tk), lambda i, j, k: (i, k)); cx = 1
    if y_trans:
        y_spec = pl.BlockSpec((tn, tk), lambda i, j, k: (j, k)); cy = 1
    else:
        y_spec = pl.BlockSpec((tk, tn), lambda i, j, k: (k, j)); cy = 0
    dn = (((cx,), (cy,)), ((), ()))

    out = pl.pallas_call(
        functools.partial(_mm_kernel, dn, 2),
        out_shape=jax.ShapeDtypeStruct((Mp, Np), jnp.float32),
        grid=(Mp // tm, Np // tn, Kp // tk),
        in_specs=[x_spec, y_spec],
        out_specs=pl.BlockSpec((tm, tn), lambda i, j, k: (i, j)),
        compiler_params=pltpu.CompilerParams(
            dimension_semantics=("parallel", "parallel", "arbitrary"),
            vmem_limit_bytes=_VMEM_LIMIT),
    )(x2, y2)
    if (Mp, Np) != (M, N):
        out = out[:M, :N]
    return out


def _matmul_batched(xb, yb, B, M, K, N, x_trans, y_trans):
    max_m, max_n, max_k = _mm_max_tiles()
    tm = _pick_tile(M, max_m, 128 if x_trans else 16)
    tn = _pick_tile(N, max_n, 128)
    tk = _pick_tile(K, max_k, 128)
    per_batch = 2 * (tm * tk + tk * tn) + 4 * tm * tn
    Bb = int(max(1, min(B, 8, _MM_BATCH_BUDGET // per_batch)))
    Mp, Kp, Np = _round_up(M, tm), _round_up(K, tk), _round_up(N, tn)
    Bp = _round_up(B, Bb)

    xs = (Bp, Kp, Mp) if x_trans else (Bp, Mp, Kp)
    ys = (Bp, Np, Kp) if y_trans else (Bp, Kp, Np)
    if tuple(xb.shape) != xs:
        xb = jnp.pad(xb, [(0, xs[i] - xb.shape[i]) for i in range(3)])
    if tuple(yb.shape) != ys:
        yb = jnp.pad(yb, [(0, ys[i] - yb.shape[i]) for i in range(3)])

    if x_trans:
        x_spec = pl.BlockSpec((Bb, tk, tm), lambda b, i, j, k: (b, k, i)); cx = 1
    else:
        x_spec = pl.BlockSpec((Bb, tm, tk), lambda b, i, j, k: (b, i, k)); cx = 2
    if y_trans:
        y_spec = pl.BlockSpec((Bb, tn, tk), lambda b, i, j, k: (b, j, k)); cy = 2
    else:
        y_spec = pl.BlockSpec((Bb, tk, tn), lambda b, i, j, k: (b, k, j)); cy = 1
    dn = (((cx,), (cy,)), ((0,), (0,)))

    out = pl.pallas_call(
        functools.partial(_mm_kernel, dn, 3),
        out_shape=jax.ShapeDtypeStruct((Bp, Mp, Np), jnp.float32),
        grid=(Bp // Bb, Mp // tm, Np // tn, Kp // tk),
        in_specs=[x_spec, y_spec],
        out_specs=pl.BlockSpec((Bb, tm, tn), lambda b, i, j, k: (b, i, j)),
        compiler_params=pltpu.CompilerParams(
            dimension_semantics=("parallel", "parallel", "parallel", "arbitrary"),
            vmem_limit_bytes=_VMEM_LIMIT),
    )(xb, yb)
    if (Bp, Mp, Np) != (B, M, N):
        out = out[:B, :M, :N]
    return out


def _matmul(x, y, x_trans=False, y_trans=False):
    # bf16 operands for the MXU (review item); accumulation stays f32.
    x = jnp.asarray(x).astype(_MM_IN_DTYPE)
    y = jnp.asarray(y).astype(_MM_IN_DTYPE)
    assert x.ndim >= 2 and y.ndim >= 2  # TODO(synk): 1-D (vector) matmul not supported

    if x_trans:
        K, M = x.shape[-2:]
    else:
        M, K = x.shape[-2:]
    if y_trans:
        N, K2 = y.shape[-2:]
    else:
        K2, N = y.shape[-2:]
    assert K == K2, "inner dimensions must match"

    batch = jnp.broadcast_shapes(x.shape[:-2], y.shape[:-2])
    B = math.prod(batch) if batch else 1
    y_batch_elems = math.prod(y.shape[:-2]) if y.ndim > 2 else 1
    can_fold = ((not x_trans) and y_batch_elems == 1
                and tuple(x.shape[:-2]) == tuple(batch))

    if B == 1 or can_fold:
        # Shared RHS: fold batch into M (fills MXU rows, no broadcast of y).
        if x_trans:
            x2 = x.reshape(x.shape[-2:])
            M2 = M
        else:
            x2 = x.reshape(-1, K)
            M2 = x2.shape[0]
        y2 = y.reshape(y.shape[-2:])
        out = _matmul_2d(x2, y2, M2, K, N, x_trans, y_trans)
        return out.reshape(batch + (M, N))

    # General batched path.
    # TODO(synk): an operand that is broadcast across batch here still
    # materializes its broadcast copy in HBM.
    xs_log = (K, M) if x_trans else (M, K)
    ys_log = (N, K) if y_trans else (K, N)
    xb = jnp.broadcast_to(x, batch + xs_log).reshape((B,) + xs_log)
    yb = jnp.broadcast_to(y, batch + ys_log).reshape((B,) + ys_log)
    out = _matmul_batched(xb, yb, B, M, K, N, x_trans, y_trans)
    return out.reshape(batch + (M, N))


# ----------------------------------------------------------------------------
# Reductions (sum / mean)
# ----------------------------------------------------------------------------
def _full_reduce_kernel(inv_count, x_ref, o_ref, acc_ref):
    @pl.when(pl.program_id(0) == 0)
    def _():
        acc_ref[...] = jnp.zeros_like(acc_ref)

    blk = x_ref[...]                                     # (br, 128)
    # sublane-major grouping: layout-preserving reshape, pure VPU adds
    acc_ref[...] += jnp.sum(blk.reshape(-1, _SUBLANES, _LANES), axis=0)

    @pl.when(pl.program_id(0) == pl.num_programs(0) - 1)
    def _():
        tot = jnp.sum(acc_ref[...]) * inv_count
        o_ref[...] = _fake_quant(tot).reshape(1, 1)


def _full_reduce(x, inv_count):
    # TODO(synk): on v7x a parallel split over both TensorCores + a tiny combine
    # stage would double streaming bandwidth for this path.
    flat = x.reshape(-1)
    n = flat.shape[0]
    rows = max(_SUBLANES, _round_up(-(-n // _LANES), _SUBLANES))
    nb = -(-rows // _BLOCK_ROWS)
    br = _round_up(-(-rows // nb), _SUBLANES)
    rows_p = br * nb
    padded = rows_p * _LANES
    if padded != n:
        flat = jnp.pad(flat, (0, padded - n))            # zero pad is sum-safe
    x2 = flat.reshape(rows_p, _LANES)
    out = pl.pallas_call(
        functools.partial(_full_reduce_kernel, inv_count),
        out_shape=jax.ShapeDtypeStruct((1, 1), jnp.float32),
        grid=(nb,),
        in_specs=[pl.BlockSpec((br, _LANES), lambda i: (i, 0))],
        out_specs=pl.BlockSpec((1, 1), lambda i: (0, 0)),
        scratch_shapes=[pltpu.VMEM((_SUBLANES, _LANES), jnp.float32)],
        compiler_params=pltpu.CompilerParams(
            dimension_semantics=("arbitrary",), vmem_limit_bytes=_VMEM_LIMIT),
    )(x2)
    return out[0, 0]


def _suffix_reduce_kernel(inv_count, x_ref, o_ref, acc_ref):
    @pl.when(pl.program_id(1) == 0)
    def _():
        acc_ref[...] = jnp.zeros_like(acc_ref)

    blk = x_ref[...]                                     # (tp, tr)
    s = acc_ref[...]
    for j in range(blk.shape[1] // _LANES):              # lane-dense VPU adds only
        s = s + blk[:, j * _LANES:(j + 1) * _LANES]
    acc_ref[...] = s

    @pl.when(pl.program_id(1) == pl.num_programs(1) - 1)
    def _():
        # single cross-lane (XLU) reduce at finalize
        o_ref[...] = _fake_quant(
            jnp.sum(acc_ref[...], axis=1, keepdims=True) * inv_count)


def _suffix_reduce(x2, inv_count):
    P, R = x2.shape
    tp = _pick_tile(P, _RED_TP, _SUBLANES)
    tr = _pick_tile(R, _RED_TR, _LANES)
    Pp, Rp = _round_up(P, tp), _round_up(R, tr)
    if (Pp, Rp) != (P, R):
        x2 = jnp.pad(x2, ((0, Pp - P), (0, Rp - R)))     # zero pad is sum-safe
    out = pl.pallas_call(
        functools.partial(_suffix_reduce_kernel, inv_count),
        out_shape=jax.ShapeDtypeStruct((Pp, 1), jnp.float32),
        grid=(Pp // tp, Rp // tr),
        in_specs=[pl.BlockSpec((tp, tr), lambda i, k: (i, k))],
        out_specs=pl.BlockSpec((tp, 1), lambda i, k: (i, 0)),
        scratch_shapes=[pltpu.VMEM((tp, _LANES), jnp.float32)],
        compiler_params=pltpu.CompilerParams(
            dimension_semantics=("parallel", "arbitrary"),
            vmem_limit_bytes=_VMEM_LIMIT),
    )(x2)
    return out[:P, 0]


def _mid_reduce_kernel(inv_count, x_ref, o_ref, acc_ref):
    @pl.when(pl.program_id(2) == 0)
    def _():
        acc_ref[...] = jnp.zeros_like(acc_ref)

    acc_ref[...] += jnp.sum(x_ref[...], axis=1)          # reduce sublane axis

    @pl.when(pl.program_id(2) == pl.num_programs(2) - 1)
    def _():
        o_ref[...] = _fake_quant(acc_ref[...] * inv_count)


def _mid_reduce(x3, inv_count):
    # (A, R, C): reduce the middle axis, last dim stays the lane dim (no transpose).
    A, R, C = x3.shape
    tc = _pick_tile(C, 1024, _LANES)
    tr = _pick_tile(R, 512, _SUBLANES)
    max_ta = max(1, (2 * 1024 * 1024) // (tr * tc * 4))
    ta = _pick_tile(A, max_ta, 1)
    Ap, Rp, Cp = _round_up(A, ta), _round_up(R, tr), _round_up(C, tc)
    if (Ap, Rp, Cp) != (A, R, C):
        x3 = jnp.pad(x3, ((0, Ap - A), (0, Rp - R), (0, Cp - C)))
    out = pl.pallas_call(
        functools.partial(_mid_reduce_kernel, inv_count),
        out_shape=jax.ShapeDtypeStruct((Ap, Cp), jnp.float32),
        grid=(Ap // ta, Cp // tc, Rp // tr),
        in_specs=[pl.BlockSpec((ta, tr, tc), lambda a, c, r: (a, r, c))],
        out_specs=pl.BlockSpec((ta, tc), lambda a, c, r: (a, c)),
        scratch_shapes=[pltpu.VMEM((ta, tc), jnp.float32)],
        compiler_params=pltpu.CompilerParams(
            dimension_semantics=("parallel", "parallel", "arbitrary"),
            vmem_limit_bytes=_VMEM_LIMIT),
    )(x3)
    return out[:A, :C]


def _reduce(x, dim, keepdim, is_mean):
    x = jnp.asarray(x, jnp.float32)
    ndim = x.ndim
    shape = x.shape
    if dim is None:
        axes = tuple(range(ndim))
    elif isinstance(dim, int):
        axes = (dim % ndim,)
    else:
        axes = tuple(sorted(d % ndim for d in dim))
    axes_set = set(axes)
    kept = tuple(i for i in range(ndim) if i not in axes_set)

    R = 1
    for i in axes:
        R *= shape[i]
    inv_count = (1.0 / max(R, 1)) if is_mean else 1.0

    if ndim == 0 or len(axes) == ndim:
        res = _full_reduce(x, inv_count)                       # scalar
    else:
        contiguous = axes == tuple(range(axes[0], axes[-1] + 1))
        if contiguous and axes[-1] == ndim - 1:
            P = math.prod(shape[:axes[0]]) if axes[0] > 0 else 1
            res = _suffix_reduce(x.reshape(P, R), inv_count)   # (P,)
        elif contiguous:
            A = math.prod(shape[:axes[0]]) if axes[0] > 0 else 1
            C = math.prod(shape[axes[-1] + 1:])
            res = _mid_reduce(x.reshape(A, R, C), inv_count)   # (A, C)
        else:
            # TODO(synk): non-contiguous reduced axes still pay an HBM transpose.
            xt = jnp.transpose(x, kept + axes)
            P = math.prod(tuple(shape[i] for i in kept)) if kept else 1
            res = _suffix_reduce(xt.reshape(P, R), inv_count)

    kept_shape = tuple(shape[i] for i in kept)
    res = res.reshape(kept_shape)
    if keepdim:
        res = res.reshape(tuple(1 if i in axes_set else shape[i]
                                for i in range(ndim)))
    return res


# ----------------------------------------------------------------------------
# FloatFunctional (QAT) — Pallas version
# ----------------------------------------------------------------------------
class FloatFunctional:
    """JAX/Pallas re-implementation of horizon qat FloatFunctional.

    The activation_post_process is a deterministic symmetric int8 fake-quant
    fused into every kernel. Observer statistics / dynamic qparam bookkeeping
    and QTensor scale propagation are not modeled.
    """

    def __init__(self):
        self.default_keep_dim = False

    # --- identity-with-dtype-check: post-process only ---
    def _identity(self, x):
        return _ew_unary(lambda v: v, x)

    # --- add / add_scalar ---
    def add(self, x, y):
        if isinstance(y, (int, float)):
            return self._add_scalar(x, y)
        if isinstance(x, (int, float)):
            return self._add_scalar(y, x)
        return _ew_binary(jnp.add, x, y)

    def add_scalar(self, x, y):
        return self._add_scalar(x, y)

    def _add_scalar(self, x, y):
        if y == 0:
            return self._identity(x)
        return _ew_binary(jnp.add, x, float(y))

    # --- sub ---
    def sub(self, x, y):
        if isinstance(x, (int, float)) and isinstance(y, (int, float)):
            raise ValueError(
                "Operation between scalar is not supported by FloatFunctional")
        if isinstance(x, (int, float)) and x == 0:
            return self._mul_scalar(y, -1)
        if isinstance(y, (int, float)) and y == 0:
            return self._identity(x)
        return _ew_binary(jnp.subtract, x, y)

    # --- mul / mul_scalar ---
    def mul(self, x, y):
        if isinstance(y, (int, float)):
            return self._mul_scalar(x, y)
        if isinstance(x, (int, float)):
            return self._mul_scalar(y, x)
        return _ew_binary(jnp.multiply, x, y)

    def mul_scalar(self, x, y):
        return self._mul_scalar(x, y)

    def _mul_scalar(self, x, y):
        # TODO(synk): quantized-path qscale rescale (scale * |y|) bookkeeping not modeled.
        return _ew_binary(jnp.multiply, x, float(y))

    # --- div / maximum / minimum ---
    def div(self, x, y):
        return _ew_binary(jnp.divide, x, y, y_pad=1.0)

    def maximum(self, x, y):
        return _ew_binary(jnp.maximum, x, y)

    def minimum(self, x, y):
        return _ew_binary(jnp.minimum, x, y)

    # --- unary math ---
    def exp(self, x):
        return _ew_unary(jnp.exp, x)

    def ceil(self, x):
        return _ew_unary(jnp.ceil, x)

    def floor(self, x):
        return _ew_unary(jnp.floor, x)

    # --- matmul ---
    def matmul(self, x, y, x_trans=False, y_trans=False):
        return _matmul(x, y, x_trans, y_trans)

    # --- reductions ---
    def sum(self, x, dim=None, keepdim=False):
        return _reduce(x, dim, keepdim, is_mean=False)

    def mean(self, x, dim=None, keepdim=None):
        if keepdim is None:
            keepdim = self.default_keep_dim
        return _reduce(x, dim, keepdim, is_mean=True)

    # --- cat / stack ---
    def cat(self, xs, dim=0):
        # TODO(synk): concat + fake-quant are not fused (2 HBM passes instead of 1);
        # a fully fused cat needs per-input grid segments via scalar-prefetched offsets.
        r = jnp.concatenate([jnp.asarray(t, jnp.float32) for t in xs], axis=dim)
        return self._identity(r)

    concat = cat
    concatenate = cat

    def stack(self, xs, dim=0):
        r = jnp.stack([jnp.asarray(t, jnp.float32) for t in xs], axis=dim)
        return self._identity(r)


# ----------------------------------------------------------------------------
# Demo / sanity check
# ----------------------------------------------------------------------------
if __name__ == "__main__":
    key = jax.random.PRNGKey(0)
    k1, k2, k3, k4, k5 = jax.random.split(key, 5)

    x = jax.random.normal(k1, (2, 4, 16, 16), dtype=jnp.float32)
    y = jax.random.normal(k2, (2, 4, 16, 16), dtype=jnp.float32)
    a = jax.random.normal(k3, (2, 8, 32), dtype=jnp.float32)
    b = jax.random.normal(k4, (2, 32, 16), dtype=jnp.float32)
    w = jax.random.normal(k5, (32, 16), dtype=jnp.float32)

    ff = FloatFunctional()

    r_add = ff.add(x, y)
    r_adds = ff.add_scalar(x, 1.5)
    r_add0 = ff.add_scalar(x, 0)
    r_sub = ff.sub(x, y)
    r_rsub = ff.sub(0, x)
    r_mul = ff.mul(x, y)
    r_muls = ff.mul_scalar(x, 0.25)
    r_div = ff.div(x, y + 3.0)
    r_max = ff.maximum(x, y)
    r_min = ff.minimum(x, y)
    r_exp = ff.exp(x * 0.1)
    r_ceil = ff.ceil(x)
    r_floor = ff.floor(x)
    r_mm = ff.matmul(a, b)
    r_mm_xt = ff.matmul(jnp.swapaxes(a, -1, -2), b, x_trans=True)
    r_mm_yt = ff.matmul(a, jnp.swapaxes(b, -1, -2), y_trans=True)
    r_mm_fold = ff.matmul(a, w)                      # shared-RHS (fold-batch) path
    r_sum = ff.sum(x, dim=1, keepdim=False)          # mid-axis reduce (no transpose)
    r_sum_all = ff.sum(x)                            # full-reduce streaming path
    r_sum_keep = ff.sum(x, dim=(2, 3), keepdim=True)  # suffix reduce
    r_mean = ff.mean(x, dim=-1)                      # suffix reduce
    r_cat = ff.cat([x, y], dim=1)
    r_stack = ff.stack([x, y], dim=0)

    for r in (r_add, r_adds, r_add0, r_sub, r_rsub, r_mul, r_muls, r_div, r_max,
              r_min, r_exp, r_ceil, r_floor, r_mm, r_mm_xt, r_mm_yt, r_mm_fold,
              r_sum, r_sum_all, r_sum_keep, r_mean, r_cat, r_stack):
        jax.block_until_ready(r)

    # reference checks against plain-JAX fake-quant semantics
    def fq(v):
        return jnp.clip(jnp.round(v * _INV_SCALE), _QMIN, _QMAX) * _SCALE

    assert r_add.shape == x.shape
    assert jnp.allclose(r_add, fq(x + y), atol=1e-6)
    assert jnp.allclose(r_adds, fq(x + 1.5), atol=1e-6)
    assert jnp.allclose(r_add0, fq(x), atol=1e-6)
    assert jnp.allclose(r_sub, fq(x - y), atol=1e-6)
    assert jnp.allclose(r_rsub, fq(-x), atol=1e-6)
    assert jnp.allclose(r_mul, fq(x * y), atol=1e-6)
    assert jnp.allclose(r_muls, fq(x * 0.25), atol=1e-6)
    assert jnp.allclose(r_div, fq(x / (y + 3.0)), atol=1e-6)
    assert jnp.allclose(r_max, fq(jnp.maximum(x, y)), atol=1e-6)
    assert jnp.allclose(r_min, fq(jnp.minimum(x, y)), atol=1e-6)
    assert jnp.allclose(r_ceil, fq(jnp.ceil(x)), atol=1e-6)
    assert jnp.allclose(r_floor, fq(jnp.floor(x)), atol=1e-6)
    assert r_exp.shape == x.shape

    # matmul references use bf16 operands (same as the kernel); allow one int8
    # quantization step of slack for accumulation-order / tie differences.
    mm_ref = fq(jnp.einsum("bmk,bkn->bmn",
                           a.astype(jnp.bfloat16), b.astype(jnp.bfloat16),
                           preferred_element_type=jnp.float32))
    assert r_mm.shape == (2, 8, 16)
    assert jnp.allclose(r_mm, mm_ref, atol=0.051)
    assert jnp.allclose(r_mm_xt, r_mm, atol=0.051)
    assert jnp.allclose(r_mm_yt, r_mm, atol=0.051)
    mm_fold_ref = fq(jnp.einsum("bmk,kn->bmn",
                                a.astype(jnp.bfloat16), w.astype(jnp.bfloat16),
                                preferred_element_type=jnp.float32))
    assert r_mm_fold.shape == (2, 8, 16)
    assert jnp.allclose(r_mm_fold, mm_fold_ref, atol=0.051)

    assert r_sum.shape == (2, 16, 16)
    assert jnp.allclose(r_sum, fq(jnp.sum(x, axis=1)), atol=1e-5)
    assert r_sum_all.shape == ()
    assert jnp.allclose(r_sum_all, fq(jnp.sum(x)), atol=0.051)
    assert r_sum_keep.shape == (2, 4, 1, 1)
    assert jnp.allclose(r_sum_keep, fq(jnp.sum(x, axis=(2, 3), keepdims=True)),
                        atol=0.051)
    assert r_mean.shape == (2, 4, 16)
    assert jnp.allclose(r_mean, fq(jnp.mean(x, axis=-1)), atol=1e-5)
    assert r_cat.shape == (2, 8, 16, 16)
    assert jnp.allclose(r_cat, fq(jnp.concatenate([x, y], axis=1)), atol=1e-6)
    assert r_stack.shape == (2, 2, 4, 16, 16)

    print("KERNEL_OK")
</pallas_src>

<mosaic_0001>
module attributes {stable_mosaic.version = 11 : i64} {
  func.func @_binary_kernel(%arg0: i32, %arg1: memref<16x128xf32, #tpu.memory_space<vmem>>, %arg2: memref<16x128xf32, #tpu.memory_space<vmem>>, %arg3: memref<16x128xf32, #tpu.memory_space<vmem>>) attributes {dimension_semantics = [#tpu.dimension_semantics<parallel>], iteration_bounds = array<i64: 1>, scalar_prefetch = 0 : i64, scratch_operands = 0 : i64, tpu.core_type = #tpu.core_type<tc>, window_params = [{transform_indices = @transform_0, window_bounds = array<i64: 16, 128>}, {transform_indices = @transform_1, window_bounds = array<i64: 16, 128>}, {transform_indices = @transform_2, window_bounds = array<i64: 16, 128>}]} {
    %c0 = arith.constant 0 : index
    %c0_0 = arith.constant 0 : index
    %0 = vector.load %arg1[%c0, %c0_0] : memref<16x128xf32, #tpu.memory_space<vmem>>, vector<16x128xf32>
    %c0_1 = arith.constant 0 : index
    %c0_2 = arith.constant 0 : index
    %1 = vector.load %arg2[%c0_1, %c0_2] : memref<16x128xf32, #tpu.memory_space<vmem>>, vector<16x128xf32>
    %2 = arith.addf %0, %1 : vector<16x128xf32>
    %cst = arith.constant 2.000000e+01 : f32
    %3 = vector.broadcast %cst : f32 to vector<16x128xf32>
    %4 = arith.mulf %2, %3 : vector<16x128xf32>
    %5 = math.roundeven %4 : vector<16x128xf32>
    %cst_3 = arith.constant -1.280000e+02 : f32
    %cst_4 = arith.constant 1.270000e+02 : f32
    %6 = vector.broadcast %cst_3 : f32 to vector<16x128xf32>
    %7 = arith.maximumf %6, %5 : vector<16x128xf32>
    %8 = vector.broadcast %cst_4 : f32 to vector<16x128xf32>
    %9 = arith.minimumf %8, %7 : vector<16x128xf32>
    %cst_5 = arith.constant 5.000000e-02 : f32
    %10 = vector.broadcast %cst_5 : f32 to vector<16x128xf32>
    %11 = arith.mulf %9, %10 : vector<16x128xf32>
    %c0_6 = arith.constant 0 : index
    %c0_7 = arith.constant 0 : index
    %12 = vector.load %arg3[%c0_6, %c0_7] : memref<16x128xf32, #tpu.memory_space<vmem>>, vector<16x128xf32>
    tpu.vector_store %arg3[%c0_6, %c0_7], %11 {strides = array<i32>} : memref<16x128xf32, #tpu.memory_space<vmem>>, vector<16x128xf32>,
    return
  }
  func.func @transform_0(%arg0: i32) -> (i32, i32) {
    %c0_i32 = arith.constant 0 : i32
    %c0_i32_0 = arith.constant 0 : i32
    return %arg0, %c0_i32 : i32, i32
  }
  func.func @transform_1(%arg0: i32) -> (i32, i32) {
    %c0_i32 = arith.constant 0 : i32
    %c0_i32_0 = arith.constant 0 : i32
    return %arg0, %c0_i32 : i32, i32
  }
  func.func @transform_2(%arg0: i32) -> (i32, i32) {
    %c0_i32 = arith.constant 0 : i32
    %c0_i32_0 = arith.constant 0 : i32
    return %arg0, %c0_i32 : i32, i32
  }
}

</mosaic_0001>

<bundles_post_ra>
// kernel: tpu_custom_call.1
= control target key start
LH: loop header
LB: loop body
LE: loop exit
PB: predicated region body
PF: predicated region fallthrough
CT: control target
= control target key end

     0   :  { %7 = vsyncpa [#allocation3], 0  ;;  %s220_s0 = inlined_call_operand.hbm [shape: f32[16,128], index: 0, kind: input, shape index: {}]   ;;  %s221_s1 = inlined_call_operand.hbm [shape: f32[16,128], index: 1, kind: input, shape index: {}]   ;;  %s222_s2 = inlined_call_operand.hbm [shape: f32[16,128], index: 2, kind: output, shape index: {}]  }
   0x1   :  { %8 = vsyncpa [#allocation6], 0 }
   0x2   :  { %9 = vsyncpa [#allocation4], 0  ;;  %s155_s9 = smov [#allocation2]   ;;  %s83_s13 = scalar_lea.hbm %s220_s0, 256 }
   0x3   :  { %s15_s10 = sshll.u32 %s155_s9, 4  ;;  %p84_p0 = scmp.ne.s32.totalorder %s220_s0, %s83_s13  ;;  %s16_s10 = int_to_ptr.vmem [resolvable:$true] %s15_s10 }
   0x4   :  { %p87_p1 = scmp.lt.u32.totalorder %s83_s13, %s220_s0 }
   0x6   :  { %p89_p2 = pnand %p87_p1, %p84_p0 }
   0x8   :  { %92 = shalt.err (!%p89_p2)
}
   0x9   :  { %s93_s18 = scalar_lea.vmem %s16_s10, 256  ;;  %p98_p4 = scmp.lt.s32.totalorder %s16_s10, %s16_s10 }
   0xa   :  { %p94_p3 = scmp.ne.s32.totalorder %s16_s10, %s93_s18  ;;  %p99_p5 = scmp.lt.s32.totalorder %s93_s18, %s93_s18 }
   0xc   :  { %p100_p6 = por %p99_p5, %p98_p4 }
   0xe   :  { %p101_p7 = pnand %p100_p6, %p94_p3 }
  0x10   :  { %104 = shalt.err (!%p101_p7)
}
  0x11   :  { %s156_s19 = smov 128   ;;  %s157_s20 = smov 8  }
  0x12   :  { %21 = dma.hbm_to_vmem [thread:$0]  %s220_s0, 256, %s16_s10, [#allocation3], %s156_s19, %s156_s19, %s157_s20  }
  0x13   :  { %s158_s23 = smov [#allocation5]   ;;  %s105_s27 = scalar_lea.hbm %s221_s1, 256 }
  0x14   :  { %s27_s24 = sshll.u32 %s158_s23, 4  ;;  %p106_p8 = scmp.ne.s32.totalorder %s221_s1, %s105_s27  ;;  %s28_s24 = int_to_ptr.vmem [resolvable:$true] %s27_s24 }
  0x15   :  { %p109_p9 = scmp.lt.u32.totalorder %s105_s27, %s221_s1 }
  0x17   :  { %p111_p10 = pnand %p109_p9, %p106_p8 }
  0x19   :  { %114 = shalt.err (!%p111_p10)
}
  0x1a   :  { %s115_s4 = scalar_lea.vmem %s28_s24, 256  ;;  %p120_p12 = scmp.lt.s32.totalorder %s28_s24, %s28_s24 }
  0x1b   :  { %p116_p11 = scmp.ne.s32.totalorder %s28_s24, %s115_s4  ;;  %p121_p13 = scmp.lt.s32.totalorder %s115_s4, %s115_s4 }
  0x1d   :  { %p122_p0 = por %p121_p13, %p120_p12 }
  0x1f   :  { %p123_p1 = pnand %p122_p0, %p116_p11 }
  0x21   :  { %126 = shalt.err (!%p123_p1)
}
  0x22   :  { %33 = dma.hbm_to_vmem [thread:$0]  %s221_s1, 256, %s28_s24, [#allocation6], %s156_s19, %s156_s19, %s157_s20  }
  0x23   :  { %149 = dma.done.wait [#allocation3], 256  }
  0x24   :  { %150 = vsyncadd [#allocation3], 4294967040 }
  0x25   :  { %151 = dma.done.wait [#allocation6], 256  }
  0x26   :  { %152 = vsyncadd [#allocation6], 4294967040  ;;  %v40_v0 = vld [vmem:[#allocation2] sm:$0xff]  ;;  %v42_v1 = vld [vmem:[#allocation5] sm:$0xff]  ;;  %s159_s6 = smov [#allocation7]  }
  0x27   :  { %v41_v2 = vld [vmem:[#allocation2 + $0x8] sm:$0xff]  ;;  %v44_v3 = vadd.f32 %v42_v1, %v40_v0  ;;  %v43_v4 = vld [vmem:[#allocation5 + $0x8] sm:$0xff]  ;;  %s63_s7 = sshll.u32 %s159_s6, 4  ;;  %s64_s7 = int_to_ptr.vmem [resolvable:$true] %s63_s7 }
  0x28   :  { %v45_v5 = vadd.f32 %v43_v4, %v41_v2  ;;  %s127_s1 = scalar_lea.vmem %s64_s7, 256  ;;  %p132_p3 = scmp.lt.s32.totalorder %s64_s7, %s64_s7 }
  0x29   :  { %v46_v6 = vmul.f32 20.0, %v44_v3  ;;  %p128_p2 = scmp.ne.s32.totalorder %s64_s7, %s127_s1  ;;  %p133_p4 = scmp.lt.s32.totalorder %s127_s1, %s127_s1 }
  0x2a   :  { %v47_v7 = vmul.f32 20.0, %v45_v5 }
  0x2b   :  { %v76_v8 = vround.rtne.f32 %v46_v6  ;;  %p134_p5 = por %p133_p4, %p132_p3 }
  0x2c   :  { %v77_v9 = vround.rtne.f32 %v47_v7 }
  0x2d   :  { %v50_v10 = vmax.f32 %v76_v8, -128.0  ;;  %p135_p6 = pnand %p134_p5, %p128_p2 }
  0x2e   :  { %v51_v11 = vmax.f32 %v77_v9, -128.0 }
  0x2f   :  { %v52_v12 = vmin.f32 %v50_v10, 127.0 }
  0x30   :  { %v53_v13 = vmin.f32 %v51_v11, 127.0 }
  0x31   :  { %v54_v14 = vmul.f32 0.05, %v52_v12 }
  0x32   :  { %v55_v15 = vmul.f32 0.05, %v53_v13 }
  0x33   :  { %56 = vst [vmem:[#allocation7] sm:$0xff] %v54_v14 }
  0x34   :  { %57 = vst [vmem:[#allocation7 + $0x8] sm:$0xff] %v55_v15 }
  0x35   :  { %138 = shalt.err (!%p135_p6)
}
  0x36   :  { %s139_s10 = scalar_lea.hbm %s222_s2, 256 }
  0x37   :  { %p140_p7 = scmp.ne.s32.totalorder %s222_s2, %s139_s10  ;;  %p143_p8 = scmp.lt.u32.totalorder %s139_s10, %s222_s2 }
  0x39   :  { %p145_p9 = pnand %p143_p8, %p140_p7 }
  0x3b   :  { %148 = shalt.err (!%p145_p9)
}
  0x3c   :  { %69 = dma.vmem_to_hbm [thread:$0]  %s64_s7, 256, %s222_s2, [#allocation4], %s156_s19, %s156_s19, %s157_s20  }
  0x3d   :  { %153 = dma.done.wait [#allocation4], 256  }
  0x3e   :  { %154 = vsyncadd [#allocation4], 4294967040 }
  0x3f   :  { %73 = vsyncpa [#allocation3], 1 }
  0x40   :  { %74 = vsyncpa [#allocation6], 1 }
  0x41   :  { %75 = vsyncpa [#allocation4], 1 }

</bundles_post_ra>
